<compile_context>
chip_gen: v5e
topology: v5e:2x2
jax: 0.10.0
libtpu: 0.0.40
codegen_flags: <defaults>
</compile_context>

<pallas_src>
import numpy as np
import jax
import jax.numpy as jnp
from jax.experimental import pallas as pl
from jax.experimental.pallas import tpu as pltpu


# ---------------------------------------------------------------------------
# Static routing tables (depend only on tree depth, not on parameters).
#   node[l, j]: decision column used by leaf j at level l (PyTorch heap index;
#               column 0 of the linear output is intentionally unused).
#   sign[l, j]: +1 -> factor = sigmoid(z[:, node]),
#               -1 -> factor = 1 - sigmoid(z[:, node]) = sigmoid(-z[:, node]).
# ---------------------------------------------------------------------------
def _routing_tables(depth):
    L = 2 ** depth
    node = np.zeros((depth, L), np.int32)
    sign = np.zeros((depth, L), np.float32)
    for l in range(depth):
        for j in range(L):
            node[l, j] = 2 ** l + (j >> (depth - l))
            sign[l, j] = 1.0 if ((j >> (depth - 1 - l)) & 1) == 0 else -1.0
    return node, sign


# ---------------------------------------------------------------------------
# Wrapper-side parameter packing (done once; kernel streams dense weights).
# ---------------------------------------------------------------------------
def pack_forest_params(masks, ws, bs, pis, depth, tree_block=None,
                       weight_block_budget=4 << 20):
    T, F, _ = masks.shape
    L = 2 ** depth
    C = pis.shape[-1]

    if tree_block is None:
        per_tree_bytes = F * depth * L * 4
        cap = max(1, weight_block_budget // per_tree_bytes)
        tree_block = max(d for d in range(1, T + 1) if T % d == 0 and d <= cap)
    Gt = T // tree_block

    node, sign = _routing_tables(depth)

    # Fold the (exact, one-hot) feature mask into the linear weight.  HIGHEST
    # precision keeps the fold bit-exact w.r.t. the original f32 weights.
    Weff = jnp.einsum('tfu,tul->tfl', masks, ws,
                      precision=jax.lax.Precision.HIGHEST)     # [T, F, L]
    beff = bs[:, 0, :]                                          # [T, L]

    # Fold the routing (per-level column gather + sign) into weights/bias.
    W_lvl = Weff[:, :, node] * sign[None, None, :, :]           # [T, F, depth, L]
    b_lvl = beff[:, node] * sign[None, :, :]                    # [T, depth, L]

    # Lane-dense layout: last dim ordered (level, tree_in_block, leaf).
    D = depth * tree_block * L
    W_route = (W_lvl.reshape(Gt, tree_block, F, depth, L)
                    .transpose(0, 2, 3, 1, 4)
                    .reshape(Gt, F, D))                         # [Gt, F, D]
    b_route = (b_lvl.reshape(Gt, tree_block, depth, L)
                    .transpose(0, 2, 1, 3)
                    .reshape(Gt, 1, D))                         # [Gt, 1, D]

    # Precompute softmax(pi) and fold the final 1/n_tree scale.
    pi_soft = jax.nn.softmax(pis, axis=-1) / T                  # [T, L, C]
    pi_cat = pi_soft.reshape(Gt, tree_block * L, C)             # [Gt, TB*L, C]

    return W_route, b_route, pi_cat


# ---------------------------------------------------------------------------
# Pallas kernel: grid = (batch tiles, tree blocks); accumulate into out_ref.
# ---------------------------------------------------------------------------
def forest_kernel(x_ref, w_ref, b_ref, pi_ref, out_ref):
    g = pl.program_id(1)

    @pl.when(g == 0)
    def _init():
        out_ref[...] = jnp.zeros_like(out_ref)

    # One MXU matmul covers all levels of all trees in this block.
    z = jnp.dot(x_ref[...], w_ref[...],
                preferred_element_type=jnp.float32) + b_ref[...]   # [bt, depth*TB*L]
    f = jax.nn.sigmoid(z)                                          # EUP

    tl = pi_ref.shape[0]                     # TB * L   (static)
    depth = f.shape[1] // tl
    mu = f[:, 0:tl]
    for l in range(1, depth):                # static unrolled elementwise product
        mu = mu * f[:, l * tl:(l + 1) * tl]

    # [bt, TB*L] @ [TB*L, C] contracts over trees and leaves simultaneously.
    out_ref[...] += jnp.dot(mu, pi_ref[...], preferred_element_type=jnp.float32)


def _round_up(n, m):
    return (n + m - 1) // m * m


def forest_forward(x, w_route, b_route, pi_cat, *, batch_tile=None,
                   vmem_limit_bytes=32 << 20):
    B, F = x.shape
    Gt, _, D = w_route.shape
    tl = pi_cat.shape[1]
    C = pi_cat.shape[-1]

    if batch_tile is None:
        batch_tile = min(256, _round_up(B, 8))     # 256 = v6e/v7x MXU height
    Bp = _round_up(B, batch_tile)
    xp = x if Bp == B else jnp.pad(x, ((0, Bp - B), (0, 0)))
    grid = (Bp // batch_tile, Gt)

    cost = pl.CostEstimate(
        flops=int(2 * Bp * Gt * (F * D + tl * C) + Bp * Gt * D),
        transcendentals=int(Bp * Gt * D),
        bytes_accessed=int(4 * (xp.size + w_route.size + b_route.size
                                + pi_cat.size + Bp * C)),
    )

    out = pl.pallas_call(
        forest_kernel,
        out_shape=jax.ShapeDtypeStruct((Bp, C), jnp.float32),
        grid_spec=pltpu.PrefetchScalarGridSpec(
            num_scalar_prefetch=0,
            grid=grid,
            in_specs=[
                pl.BlockSpec((batch_tile, F), lambda b, g: (b, 0)),      # x
                pl.BlockSpec((None, F, D),    lambda b, g: (g, 0, 0)),   # routed W
                pl.BlockSpec((None, 1, D),    lambda b, g: (g, 0, 0)),   # routed b
                pl.BlockSpec((None, tl, C),   lambda b, g: (g, 0, 0)),   # softmaxed pi
            ],
            out_specs=pl.BlockSpec((batch_tile, C), lambda b, g: (b, 0)),
        ),
        compiler_params=pltpu.CompilerParams(
            dimension_semantics=("parallel", "arbitrary"),
            vmem_limit_bytes=vmem_limit_bytes),
        cost_estimate=cost,
    )(xp, w_route, b_route, pi_cat)

    return out[:B] if Bp != B else out


# ---------------------------------------------------------------------------
# Deterministic parameter init (mirrors Tree.__init__ shapes).
# ---------------------------------------------------------------------------
def init_forest(key, n_tree, depth, n_in, rate, n_class):
    L = 2 ** depth
    Fu = int(n_in * rate)
    masks, ws, bs, pis = [], [], [], []
    for k in jax.random.split(key, n_tree):
        k1, k2, k3, k4 = jax.random.split(k, 4)
        idx = jax.random.permutation(k1, n_in)[:Fu]
        mask = jnp.zeros((n_in, Fu), jnp.float32).at[idx, jnp.arange(Fu)].set(1.0)
        bound = 1.0 / np.sqrt(Fu)
        W = jax.random.uniform(k2, (Fu, L), jnp.float32, -bound, bound)
        b = jax.random.uniform(k3, (1, L), jnp.float32, -bound, bound)
        pi = jax.random.uniform(k4, (L, n_class), jnp.float32, 0.0, 1.0)
        masks.append(mask); ws.append(W); bs.append(b); pis.append(pi)
    return jnp.stack(masks), jnp.stack(ws), jnp.stack(bs), jnp.stack(pis)


# ---------------------------------------------------------------------------
# float64 numpy reference following the PyTorch code literally (verification).
# ---------------------------------------------------------------------------
def forest_ref_np(x, masks, ws, bs, pis, depth):
    x = np.asarray(x, np.float64)
    masks = np.asarray(masks, np.float64)
    ws = np.asarray(ws, np.float64)
    bs = np.asarray(bs, np.float64)
    pis = np.asarray(pis, np.float64)
    T = masks.shape[0]
    L = 2 ** depth
    B = x.shape[0]
    acc = np.zeros((B, pis.shape[-1]), np.float64)
    for t in range(T):
        feats = x @ masks[t]
        z = feats @ ws[t] + bs[t]
        d = 1.0 / (1.0 + np.exp(-z))                        # [B, L]
        dd = np.stack([d, 1.0 - d], axis=2)                 # [B, L, 2]
        mu = np.ones((B, 1, 1), np.float64)
        begin, end = 1, 2
        for nl in range(depth):
            mu = np.repeat(mu.reshape(B, -1, 1), 2, axis=2)
            mu = mu * dd[:, begin:end, :]
            begin = end
            end = begin + 2 ** (nl + 1)
        mu = mu.reshape(B, L)
        e = np.exp(pis[t] - pis[t].max(-1, keepdims=True))
        pi = e / e.sum(-1, keepdims=True)
        acc = acc + mu @ pi
    return acc / T


if __name__ == "__main__":
    def run_case(key, B, n_in, n_tree, depth, rate, n_class):
        kx, kp = jax.random.split(key)
        x = jax.random.normal(kx, (B, n_in), jnp.float32)
        masks, ws, bs, pis = init_forest(kp, n_tree, depth, n_in, rate, n_class)
        w_route, b_route, pi_cat = pack_forest_params(masks, ws, bs, pis, depth)
        out = jax.block_until_ready(forest_forward(x, w_route, b_route, pi_cat))
        assert out.shape == (B, n_class)
        out_np = np.asarray(out, np.float64)
        # Each row of the forest output is a probability distribution.
        assert np.allclose(out_np.sum(-1), 1.0, atol=1e-3), out_np.sum(-1)
        ref = forest_ref_np(x, masks, ws, bs, pis, depth)
        assert np.allclose(out_np, ref, rtol=2e-2, atol=2e-3), \
            float(np.abs(out_np - ref).max())

    key = jax.random.PRNGKey(0)
    k1, k2 = jax.random.split(key)
    # Small shapes consistent with Forest(n_tree, tree_depth, n_in_feature,
    # tree_feature_rate, n_class, jointly_training=True).
    run_case(k1, B=8, n_in=32, n_tree=4, depth=3, rate=0.5, n_class=4)
    # Deeper-tree check (guards the routing-fold rewrite).
    run_case(k2, B=16, n_in=64, n_tree=2, depth=5, rate=0.5, n_class=6)
    print("KERNEL_OK")
</pallas_src>

<mosaic_0001>
module attributes {stable_mosaic.version = 11 : i64} {
  func.func @forest_kernel(%arg0: i32, %arg1: i32, %arg2: memref<8x32xf32, #tpu.memory_space<vmem>>, %arg3: memref<1x32x96xf32, #tpu.memory_space<vmem>>, %arg4: memref<1x1x96xf32, #tpu.memory_space<vmem>>, %arg5: memref<1x32x4xf32, #tpu.memory_space<vmem>>, %arg6: memref<8x4xf32, #tpu.memory_space<vmem>>) attributes {dimension_semantics = [#tpu.dimension_semantics<parallel>, #tpu.dimension_semantics<arbitrary>], iteration_bounds = array<i64: 1, 1>, scalar_prefetch = 0 : i64, scratch_operands = 0 : i64, tpu.core_type = #tpu.core_type<tc>, window_params = [{transform_indices = @transform_0, window_bounds = array<i64: 8, 32>}, {transform_indices = @transform_1, window_bounds = array<i64: 1, 32, 96>}, {transform_indices = @transform_2, window_bounds = array<i64: 1, 1, 96>}, {transform_indices = @transform_3, window_bounds = array<i64: 1, 32, 4>}, {transform_indices = @transform_4, window_bounds = array<i64: 8, 4>}]} {
    %c0_i32 = arith.constant 0 : i32
    %0 = arith.cmpi eq, %arg1, %c0_i32 : i32
    %1 = arith.extui %0 : i1 to i32
    %c0_i32_0 = arith.constant 0 : i32
    %2 = arith.cmpi ne, %1, %c0_i32_0 : i32
    scf.if %2 {
      %cst_17 = arith.constant 0.000000e+00 : f32
      %27 = vector.broadcast %cst_17 : f32 to vector<8x4xf32>
      %c0_18 = arith.constant 0 : index
      %c0_19 = arith.constant 0 : index
      %28 = vector.load %arg6[%c0_18, %c0_19] : memref<8x4xf32, #tpu.memory_space<vmem>>, vector<8x4xf32>
      tpu.vector_store %arg6[%c0_18, %c0_19], %27 {strides = array<i32>} : memref<8x4xf32, #tpu.memory_space<vmem>>, vector<8x4xf32>,
    } else {
    }
    %c0 = arith.constant 0 : index
    %c0_1 = arith.constant 0 : index
    %3 = vector.load %arg2[%c0, %c0_1] : memref<8x32xf32, #tpu.memory_space<vmem>>, vector<8x32xf32>
    %c0_2 = arith.constant 0 : index
    %c0_3 = arith.constant 0 : index
    %c0_4 = arith.constant 0 : index
    %4 = vector.load %arg3[%c0_2, %c0_3, %c0_4] : memref<1x32x96xf32, #tpu.memory_space<vmem>>, vector<1x32x96xf32>
    %5 = vector.shape_cast %4 : vector<1x32x96xf32> to vector<32x96xf32>
    %cst = arith.constant dense<0.000000e+00> : vector<8x96xf32>
    %6 = tpu.matmul %3, %5, %cst {dimension_numbers = #tpu.dot_dimension_numbers<[1], [0], [0], [1], [0, 0, 1, 1], [], []>} : vector<8x32xf32>, vector<32x96xf32>, vector<8x96xf32> -> vector<8x96xf32>
    %c0_5 = arith.constant 0 : index
    %c0_6 = arith.constant 0 : index
    %c0_7 = arith.constant 0 : index
    %7 = vector.load %arg4[%c0_5, %c0_6, %c0_7] : memref<1x1x96xf32, #tpu.memory_space<vmem>>, vector<1x1x96xf32>
    %8 = vector.shape_cast %7 : vector<1x1x96xf32> to vector<1x96xf32>
    %9 = vector.broadcast %8 : vector<1x96xf32> to vector<8x96xf32>
    %10 = arith.addf %6, %9 : vector<8x96xf32>
    %11 = arith.negf %10 : vector<8x96xf32>
    %12 = math.exp %11 : vector<8x96xf32>
    %cst_8 = arith.constant 1.000000e+00 : f32
    %13 = vector.broadcast %cst_8 : f32 to vector<8x96xf32>
    %14 = arith.addf %13, %12 : vector<8x96xf32>
    %15 = arith.divf %13, %14 : vector<8x96xf32>
    %16 = vector.extract_strided_slice %15 {offsets = [0, 0], sizes = [8, 32], strides = [1, 1]} : vector<8x96xf32> to vector<8x32xf32>
    %17 = vector.extract_strided_slice %15 {offsets = [0, 32], sizes = [8, 32], strides = [1, 1]} : vector<8x96xf32> to vector<8x32xf32>
    %18 = arith.mulf %16, %17 : vector<8x32xf32>
    %19 = vector.extract_strided_slice %15 {offsets = [0, 64], sizes = [8, 32], strides = [1, 1]} : vector<8x96xf32> to vector<8x32xf32>
    %20 = arith.mulf %18, %19 : vector<8x32xf32>
    %c0_9 = arith.constant 0 : index
    %c0_10 = arith.constant 0 : index
    %21 = vector.load %arg6[%c0_9, %c0_10] : memref<8x4xf32, #tpu.memory_space<vmem>>, vector<8x4xf32>
    %c0_11 = arith.constant 0 : index
    %c0_12 = arith.constant 0 : index
    %c0_13 = arith.constant 0 : index
    %22 = vector.load %arg5[%c0_11, %c0_12, %c0_13] : memref<1x32x4xf32, #tpu.memory_space<vmem>>, vector<1x32x4xf32>
    %23 = vector.shape_cast %22 : vector<1x32x4xf32> to vector<32x4xf32>
    %cst_14 = arith.constant dense<0.000000e+00> : vector<8x4xf32>
    %24 = tpu.matmul %20, %23, %cst_14 {dimension_numbers = #tpu.dot_dimension_numbers<[1], [0], [0], [1], [0, 0, 1, 1], [], []>} : vector<8x32xf32>, vector<32x4xf32>, vector<8x4xf32> -> vector<8x4xf32>
    %25 = arith.addf %21, %24 : vector<8x4xf32>
    %c0_15 = arith.constant 0 : index
    %c0_16 = arith.constant 0 : index
    %26 = vector.load %arg6[%c0_15, %c0_16] : memref<8x4xf32, #tpu.memory_space<vmem>>, vector<8x4xf32>
    tpu.vector_store %arg6[%c0_15, %c0_16], %25 {strides = array<i32>} : memref<8x4xf32, #tpu.memory_space<vmem>>, vector<8x4xf32>,
    return
  }
  func.func @transform_0(%arg0: i32, %arg1: i32) -> (i32, i32) {
    %c0_i32 = arith.constant 0 : i32
    %c0_i32_0 = arith.constant 0 : i32
    return %arg0, %c0_i32 : i32, i32
  }
  func.func @transform_1(%arg0: i32, %arg1: i32) -> (i32, i32, i32) {
    %c0_i32 = arith.constant 0 : i32
    %c0_i32_0 = arith.constant 0 : i32
    %c0_i32_1 = arith.constant 0 : i32
    return %arg1, %c0_i32, %c0_i32_0 : i32, i32, i32
  }
  func.func @transform_2(%arg0: i32, %arg1: i32) -> (i32, i32, i32) {
    %c0_i32 = arith.constant 0 : i32
    %c0_i32_0 = arith.constant 0 : i32
    %c0_i32_1 = arith.constant 0 : i32
    return %arg1, %c0_i32, %c0_i32_0 : i32, i32, i32
  }
  func.func @transform_3(%arg0: i32, %arg1: i32) -> (i32, i32, i32) {
    %c0_i32 = arith.constant 0 : i32
    %c0_i32_0 = arith.constant 0 : i32
    %c0_i32_1 = arith.constant 0 : i32
    return %arg1, %c0_i32, %c0_i32_0 : i32, i32, i32
  }
  func.func @transform_4(%arg0: i32, %arg1: i32) -> (i32, i32) {
    %c0_i32 = arith.constant 0 : i32
    %c0_i32_0 = arith.constant 0 : i32
    return %arg0, %c0_i32 : i32, i32
  }
}

</mosaic_0001>

<bundles_post_ra>
// kernel: tpu_custom_call.1
= control target key start
LH: loop header
LB: loop body
LE: loop exit
PB: predicated region body
PF: predicated region fallthrough
CT: control target
= control target key end

     0   :  { %9 = vsyncpa [#allocation3], 0  ;;  %s172_s18 = smov [#allocation2]   ;;  %s242_s0 = inlined_call_operand.hbm [shape: f32[8,32], index: 0, kind: input, shape index: {}]   ;;  %s243_s1 = inlined_call_operand.vmem [shape: f32[1,32,96], index: 1, kind: input, shape index: {}]   ;;  %s244_s2 = inlined_call_operand.vmem [shape: f32[1,1,96], index: 2, kind: input, shape index: {}]   ;;  %s245_s3 = inlined_call_operand.vmem [shape: f32[1,32,4], index: 3, kind: input, shape index: {}]   ;;  %s246_s4 = inlined_call_operand.vmem [shape: f32[8,4], index: 4, kind: output, shape index: {}]  }
   0x1   :  { %s15_s17 = sshll.u32 %s242_s0, 4  ;;  %s17_s19 = sshll.u32 %s172_s18, 4  ;;  %s16_s17 = int_to_ptr.hbm [resolvable:$true] %s15_s17  ;;  %s18_s19 = int_to_ptr.vmem [resolvable:$true] %s17_s19 }
   0x2   :  { %20 = dma.hbm_to_vmem [thread:$0]  %s16_s17, 128, %s18_s19, [#allocation3]  }
   0x3   :  { %170 = dma.done.wait [#allocation3], 128  }
   0x4   :  { %171 = vsyncadd [#allocation3], 4294967168  ;;  %v41_v0 = vld [vmem:[%s243_s1 + $0x18] sm:$0xff]  ;;  %v40_v1 = vld [vmem:[%s243_s1 + $0x10] sm:$0xff]  ;;  %vm46_vm0 = vcmask 261120   ;;  %vm35_vm5 = vcmask 31744  }
   0x5   :  { %62 = vmatpush.msra.mxu0 %v41_v0  ;;  %v39_v2 = vld [vmem:[%s243_s1 + $0x8] sm:$0xff]  ;;  %v38_v3 = vld [vmem:[%s243_s1] sm:$0xff]  ;;  %s173_s1 = smov 96   ;;  %v102_v21 = vld [vmem:[%s245_s3 + $0x18] sm:$0xff]  ;;  %v175_v25 = vmov 0.0  }
   0x6   :  { %v37_v4 = vld [vmem:[#allocation2] sm:$0xff]  ;;  %v101_v22 = vld [vmem:[%s245_s3 + $0x10] sm:$0xff]  ;;  %118 = vmatpush.msra.mxu1 %v102_v21  ;;  %v100_v23 = vld [vmem:[%s245_s3 + $0x8] sm:$0xff]  ;;  %36 = vst.msk [vmem:[%s246_s4] sm:$0xff] %vm35_vm5, %v175_v25 }
   0x7   :  { %63 = vmatpush.msra.mxu0 %v40_v1  ;;  %v141_v5 = vld [vmem:[%s244_s2] ss:$0 sm:$0xff]  ;;  %s174_s2 = smov 64  }
   0x8   :  { %119 = vmatpush.msra.mxu1 %v101_v22  ;;  %v99_v24 = vld [vmem:[%s245_s3] sm:$0xff] }
   0x9   :  { %64 = vmatpush.msra.mxu0 %v39_v2 }
   0xa   :  { %120 = vmatpush.msra.mxu1 %v100_v23 }
   0xb   :  { %65 = vmatpush.msra.mxu0 %v38_v3 }
   0xc   :  { %134 = vmatmul.msk.f32.vlgmr.msra.gmra.mxu0 %vm46_vm0, %v37_v4  ;;  %121 = vmatpush.msra.mxu1 %v99_v24 }
   0xd   :  { %v98_v30 = vld [vmem:[%s246_s4] sm:$0xff] }
  0x89   :  { %v67_v6 = vpop.f32.mrf.mxu0 }
  0x8a   :  { %v68_v7 = vadd.f32 %v141_v5, %v67_v6 }
  0x8c   :  { %v135_v8 = vmul.f32 -1.442695, %v68_v7 }
  0x8e   :  { %142 = vpow2.f32 %v135_v8 }
  0x94   :  { %v143_v9 = vpop.eup %142 }
  0x95   :  { %v73_v10 = vadd.f32 1.0, %v143_v9 }
  0x97   :  { %144 = vrcp.f32 %v73_v10  ;;  %v85_v14 = vand.u32 2147483648, %v73_v10  ;;  %v83_v16 = vand.u32 2147483647, %v73_v10  ;;  %vm79_vm2 = vweird.f32 %v73_v10 }
  0x99   :  { %v86_v18 = vor.u32 1.1754944e-38, %v85_v14  ;;  %vm84_vm4 = vcmp.eq.f32.partialorder %v83_v16, 8.507059e+37 }
  0x9d   :  { %v145_v11 = vpop.eup %144 }
  0x9e   :  { %v75_v12 = vmul.f32 %v145_v11, %v73_v10  ;;  %vm80_vm1 = vweird.f32 %v145_v11 }
  0x9f   :  { %vm81_vm3 = vmor %vm79_vm2, %vm80_vm1 }
  0xa0   :  { %v76_v13 = vsub.f32 1.0, %v75_v12 }
  0xa2   :  { %v77_v15 = vmul.f32 %v145_v11, %v76_v13 }
  0xa4   :  { %v78_v17 = vadd.f32 %v145_v11, %v77_v15 }
  0xa6   :  { %v82_v19 = vsel %vm81_vm3, %v145_v11, %v78_v17 }
  0xa7   :  { %v87_v20 = vsel %vm84_vm4, %v86_v18, %v82_v19 }
  0xa8   :  { %90 = vrot.lane.b32.xlu0 %v87_v20, %s173_s1 }
  0xb0   :  { %94 = vrot.lane.b32.xlu0 %v87_v20, %s174_s2 }
 0x11a   :  { %v91_v26 = vpop.permute.xlu0 %90 }
 0x11b   :  { %v93_v27 = vmul.f32 %v91_v26, %v87_v20 }
 0x122   :  { %v95_v28 = vpop.permute.xlu0 %94 }
 0x123   :  { %v97_v29 = vmul.f32 %v95_v28, %v93_v27 }
 0x125   :  { %136 = vmatmul.msk.f32.vlgmr.msra.gmra.mxu1 %vm46_vm0, %v97_v29 }
 0x1a2   :  { %v123_v31 = vpop.f32.mrf.mxu1 }
 0x1a3   :  { %v126_v32 = vadd.f32 %v123_v31, %v98_v30 }
 0x1a5   :  { %128 = vst.msk [vmem:[%s246_s4] sm:$0xff] %vm35_vm5, %v126_v32 }
 0x1a6   :  { %133 = vsyncpa [#allocation3], 1 }

</bundles_post_ra>
